<compile_context>
chip_gen: v7x
topology: tpu7x:2x2x1
jax: 0.10.0
libtpu: 0.0.40
codegen_flags: <defaults>
</compile_context>

<pallas_src>
import functools
import math

import jax
import jax.numpy as jnp
from jax.experimental import pallas as pl
from jax.experimental.pallas import tpu as pltpu


def eca_kernel_size(channel, b=1, gamma=2):
    k = int(abs((math.log(channel, 2) + b) / gamma))
    return k if k % 2 else k + 1


def _vmem_capacity_bytes():
    """Physical VMEM per core (generation aware); conservative fallback."""
    try:
        info = pltpu.get_tpu_info()
        cap = int(getattr(info, "vmem_capacity_bytes", 0) or 0)
        if cap > 0:
            return cap
    except Exception:
        pass
    return 64 * 1024 * 1024  # v7x-sized fallback: safe on every generation


def _pick_spatial_tile(hw, c, dtype_bytes, budget_bytes):
    """Largest lane-dense spatial tile sized by bytes (~2 MiB target).

    Pass 2 keeps ~4 live tiles (x-in and out, each double-buffered), so the
    per-block byte budget is budget/6 (one-third headroom).  If a single block
    already covers HW, collapse to the full extent (always a legal block dim,
    and then no remainder masking is needed).
    """
    max_block_bytes = max(budget_bytes // 6, 128 * c * dtype_bytes)
    target_bytes = min(2 * 1024 * 1024, max_block_bytes)
    t = (target_bytes // (c * dtype_bytes)) // 128 * 128
    t = max(int(t), 128)
    if t >= hw:
        return hw
    return t


# ------------------------------------------------------------ fused 1-pass --
def _fused_kernel(w_ref, x_ref, o_ref, *, inv_hw, k, pad):
    # w_ref: (k,)  f32 conv taps in SMEM
    # x_ref: (1, C, HW) full per-batch slab (native dtype)
    # o_ref: (1, C, HW)
    x = x_ref[0]                                                   # (C, HW)
    y = jnp.sum(x.astype(jnp.float32), axis=-1, keepdims=True) * inv_hw  # (C,1)
    c = y.shape[0]

    # k-tap zero-padded cross-correlation along the channel (sublane) axis,
    # matching nn.Conv1d(1, 1, k, padding=(k-1)//2, bias=False).
    z = jnp.zeros_like(y)
    for j in range(k):
        s = j - pad
        if s == 0:
            shifted = y
        elif s > 0:
            shifted = jnp.concatenate(
                [y[s:], jnp.zeros((s, 1), jnp.float32)], axis=0)
        else:
            shifted = jnp.concatenate(
                [jnp.zeros((-s, 1), jnp.float32), y[: c + s]], axis=0)
        z = z + w_ref[j] * shifted

    gate = jax.nn.sigmoid(z)                                       # (C, 1) f32
    # Keep the hot broadcast-multiply in the native dtype (pass is HBM-bound).
    o_ref[0] = x * gate.astype(o_ref.dtype)


# ------------------------------------------------------------------ pooling --
def _pool_kernel(x_ref, mean_ref, *, inv_hw, hw, tile):
    # x_ref   : (1, C, T)  spatial tile of one batch element
    # mean_ref: (1, C, 1)  resident f32 accumulator / final per-(B,C) mean
    h = pl.program_id(1)

    @pl.when(h == 0)
    def _():
        mean_ref[...] = jnp.zeros_like(mean_ref)

    x = x_ref[0].astype(jnp.float32)                               # (C, T)
    if hw % tile != 0:
        # Last block is partial: zero the out-of-range lanes before reducing.
        lane = jax.lax.broadcasted_iota(jnp.int32, x.shape, 1)
        x = jnp.where(h * tile + lane < hw, x, 0.0)
    mean_ref[0] = mean_ref[0] + jnp.sum(x, axis=-1, keepdims=True)

    @pl.when(h == pl.num_programs(1) - 1)
    def _():
        mean_ref[...] = mean_ref[...] * inv_hw


# ----------------------------------------------------------- broadcast-scale --
def _scale_kernel(x_ref, gate_ref, o_ref):
    # Native-dtype multiply; gate is tiny.  (On v5e an explicit one-shot f32
    # upcast of the bf16 tile would keep the VALU slot cleaner, but this pass
    # is HBM-bound, so keep it simple.)
    o_ref[0] = x_ref[0] * gate_ref[0].astype(o_ref.dtype)


# ---------------------------------------------------------------- top level --
def eca_block_pallas(x, conv_w, *, fuse=None, spatial_tile=None):
    """x: (B, C, H, W); conv_w: (k,) conv taps. Returns (B, C, H, W)."""
    B, C, H, W = x.shape
    HW = H * W
    dtype_bytes = jnp.dtype(x.dtype).itemsize
    k = int(conv_w.shape[0])
    pad = (k - 1) // 2
    conv_w = conv_w.astype(jnp.float32)
    x_flat = x.reshape(B, C, HW)

    cap = _vmem_capacity_bytes()
    vmem_limit = cap // 2                  # 32 MiB on v7x, 64 MiB on v5e/v6e
    budget = (3 * cap) // 8                # 24 MiB on v7x, 48 MiB on v5e/v6e

    # Fused single pass (1 read + 1 write of x) when the per-batch slab plus
    # double-buffering and f32 temporaries fit the VMEM budget.
    fused_bytes = C * HW * (4 * dtype_bytes + 8)
    if fuse is None:
        fuse = fused_bytes <= budget

    if fuse:
        out = pl.pallas_call(
            functools.partial(_fused_kernel, inv_hw=1.0 / HW, k=k, pad=pad),
            out_shape=jax.ShapeDtypeStruct((B, C, HW), x.dtype),
            grid_spec=pltpu.PrefetchScalarGridSpec(
                num_scalar_prefetch=0,
                grid=(B,),
                in_specs=[
                    pl.BlockSpec(memory_space=pltpu.MemorySpace.SMEM),
                    pl.BlockSpec((1, C, HW), lambda b: (b, 0, 0)),
                ],
                out_specs=pl.BlockSpec((1, C, HW), lambda b: (b, 0, 0)),
            ),
            compiler_params=pltpu.CompilerParams(
                dimension_semantics=("parallel",),
                vmem_limit_bytes=vmem_limit,
            ),
        )(conv_w, x_flat)
        return out.reshape(B, C, H, W)

    # ----------------------------------------------------- two-pass fallback --
    T = spatial_tile if spatial_tile is not None else _pick_spatial_tile(
        HW, C, dtype_bytes, budget)
    n_hw = pl.cdiv(HW, T)

    # Pass 1: per-(B, C) spatial mean; f32 accumulation directly in the
    # resident output block; reduction axis last / "arbitrary".
    pooled = pl.pallas_call(
        functools.partial(_pool_kernel, inv_hw=1.0 / HW, hw=HW, tile=T),
        out_shape=jax.ShapeDtypeStruct((B, C, 1), jnp.float32),
        grid_spec=pltpu.PrefetchScalarGridSpec(
            num_scalar_prefetch=0,
            grid=(B, n_hw),
            in_specs=[pl.BlockSpec((1, C, T), lambda b, h: (b, 0, h))],
            out_specs=pl.BlockSpec((1, C, 1), lambda b, h: (b, 0, 0)),
        ),
        compiler_params=pltpu.CompilerParams(
            dimension_semantics=("parallel", "arbitrary"),
            vmem_limit_bytes=vmem_limit,
        ),
    )(x_flat)

    # Tiny (B, C) gate: k shifted FMAs (zero-padded cross-correlation matching
    # nn.Conv1d) + sigmoid, in plain JAX / f32 — negligible vs HBM traffic.
    y = pooled[:, :, 0]                                            # (B, C) f32
    yp = jnp.pad(y, ((0, 0), (pad, pad)))
    z = sum(conv_w[j] * yp[:, j:j + C] for j in range(k))
    gate = jax.nn.sigmoid(z)[:, :, None]                           # (B, C, 1)

    # Pass 2: broadcast-scale; fully independent tiles -> both axes parallel.
    out = pl.pallas_call(
        _scale_kernel,
        out_shape=jax.ShapeDtypeStruct((B, C, HW), x.dtype),
        grid_spec=pltpu.PrefetchScalarGridSpec(
            num_scalar_prefetch=0,
            grid=(B, n_hw),
            in_specs=[
                pl.BlockSpec((1, C, T), lambda b, h: (b, 0, h)),
                pl.BlockSpec((1, C, 1), lambda b, h: (b, 0, 0)),
            ],
            out_specs=pl.BlockSpec((1, C, T), lambda b, h: (b, 0, h)),
        ),
        compiler_params=pltpu.CompilerParams(
            dimension_semantics=("parallel", "parallel"),
            vmem_limit_bytes=vmem_limit,
        ),
    )(x_flat, gate)
    return out.reshape(B, C, H, W)


def eca_block_reference(x, conv_w):
    """Pure-JAX reference matching the PyTorch forward."""
    k = conv_w.shape[0]
    pad = (k - 1) // 2
    C = x.shape[1]
    y = jnp.mean(x.astype(jnp.float32), axis=(2, 3))               # (B, C)
    yp = jnp.pad(y, ((0, 0), (pad, pad)))
    z = sum(conv_w[j].astype(jnp.float32) * yp[:, j:j + C] for j in range(k))
    s = jax.nn.sigmoid(z)                                          # (B, C)
    return x * s.astype(x.dtype)[:, :, None, None]


if __name__ == "__main__":
    key = jax.random.PRNGKey(0)
    kx, kx2, kw = jax.random.split(key, 3)

    # Channels chosen so the derived conv kernel size is > 1.
    B, C, H, W = 2, 16, 16, 16
    k = eca_kernel_size(C)                                         # C=16 -> k=3
    x = jax.random.normal(kx, (B, C, H, W), dtype=jnp.float32)
    conv_w = jax.random.normal(kw, (k,), dtype=jnp.float32) * 0.5

    # Path 1: fused single-pass kernel (per-batch slab fits VMEM).
    out = jax.block_until_ready(eca_block_pallas(x, conv_w))
    ref = eca_block_reference(x, conv_w)
    assert out.shape == (B, C, H, W)
    assert jnp.allclose(out, ref, atol=1e-5, rtol=1e-5)

    # Path 2: forced two-pass streaming path with a non-128-multiple spatial
    # extent and a small tile, exercising the masked remainder handling.
    B2, C2, H2, W2 = 2, 16, 12, 12
    x2 = jax.random.normal(kx2, (B2, C2, H2, W2), dtype=jnp.float32)
    out2 = jax.block_until_ready(
        eca_block_pallas(x2, conv_w, fuse=False, spatial_tile=128))
    ref2 = eca_block_reference(x2, conv_w)
    assert out2.shape == (B2, C2, H2, W2)
    assert jnp.allclose(out2, ref2, atol=1e-5, rtol=1e-5)

    print("KERNEL_OK")
</pallas_src>

<mosaic_0001>
module attributes {stable_mosaic.version = 11 : i64} {
  func.func @_fused_kernel(%arg0: i32, %arg1: memref<3xf32, #tpu.memory_space<smem>>, %arg2: memref<1x16x256xf32, #tpu.memory_space<vmem>>, %arg3: memref<1x16x256xf32, #tpu.memory_space<vmem>>) attributes {dimension_semantics = [#tpu.dimension_semantics<parallel>], iteration_bounds = array<i64: 2>, scalar_prefetch = 0 : i64, scratch_operands = 0 : i64, tpu.core_type = #tpu.core_type<tc>, window_params = [{transform_indices = @transform_0, window_bounds = array<i64: 3>}, {transform_indices = @transform_1, window_bounds = array<i64: 1, 16, 256>}, {transform_indices = @transform_2, window_bounds = array<i64: 1, 16, 256>}]} {
    %c0 = arith.constant 0 : index
    %c0_0 = arith.constant 0 : index
    %c0_1 = arith.constant 0 : index
    %0 = vector.load %arg2[%c0, %c0_0, %c0_1] : memref<1x16x256xf32, #tpu.memory_space<vmem>>, vector<1x16x256xf32>
    %1 = vector.shape_cast %0 : vector<1x16x256xf32> to vector<16x256xf32>
    %cst = arith.constant dense<0.000000e+00> : vector<16xf32>
    %2 = vector.multi_reduction <add>, %1, %cst [1] : vector<16x256xf32> to vector<16xf32>
    %3 = vector.shape_cast %2 : vector<16xf32> to vector<16x1xf32>
    %cst_2 = arith.constant 3.906250e-03 : f32
    %4 = vector.broadcast %cst_2 : f32 to vector<16x1xf32>
    %5 = arith.mulf %3, %4 : vector<16x1xf32>
    %cst_3 = arith.constant 0.000000e+00 : f32
    %6 = vector.broadcast %cst_3 : f32 to vector<16x1xf32>
    %cst_4 = arith.constant 0.000000e+00 : f32
    %7 = vector.broadcast %cst_4 : f32 to vector<1x1xf32>
    %8 = vector.extract_strided_slice %5 {offsets = [0, 0], sizes = [15, 1], strides = [1, 1]} : vector<16x1xf32> to vector<15x1xf32>
    %9 = tpu.concatenate %7, %8 in 0 : vector<1x1xf32>, vector<15x1xf32> -> vector<16x1xf32>
    %c0_5 = arith.constant 0 : index
    %10 = memref.load %arg1[%c0_5] : memref<3xf32, #tpu.memory_space<smem>>
    %11 = vector.broadcast %10 : f32 to vector<16x1xf32>
    %12 = arith.mulf %11, %9 : vector<16x1xf32>
    %13 = arith.addf %6, %12 : vector<16x1xf32>
    %c1 = arith.constant 1 : index
    %14 = memref.load %arg1[%c1] : memref<3xf32, #tpu.memory_space<smem>>
    %15 = vector.broadcast %14 : f32 to vector<16x1xf32>
    %16 = arith.mulf %15, %5 : vector<16x1xf32>
    %17 = arith.addf %13, %16 : vector<16x1xf32>
    %18 = vector.extract_strided_slice %5 {offsets = [1, 0], sizes = [15, 1], strides = [1, 1]} : vector<16x1xf32> to vector<15x1xf32>
    %cst_6 = arith.constant 0.000000e+00 : f32
    %19 = vector.broadcast %cst_6 : f32 to vector<1x1xf32>
    %20 = tpu.concatenate %18, %19 in 0 : vector<15x1xf32>, vector<1x1xf32> -> vector<16x1xf32>
    %c2 = arith.constant 2 : index
    %21 = memref.load %arg1[%c2] : memref<3xf32, #tpu.memory_space<smem>>
    %22 = vector.broadcast %21 : f32 to vector<16x1xf32>
    %23 = arith.mulf %22, %20 : vector<16x1xf32>
    %24 = arith.addf %17, %23 : vector<16x1xf32>
    %25 = arith.negf %24 : vector<16x1xf32>
    %26 = math.exp %25 : vector<16x1xf32>
    %cst_7 = arith.constant 1.000000e+00 : f32
    %27 = vector.broadcast %cst_7 : f32 to vector<16x1xf32>
    %28 = arith.addf %27, %26 : vector<16x1xf32>
    %29 = arith.divf %27, %28 : vector<16x1xf32>
    %30 = vector.broadcast %29 : vector<16x1xf32> to vector<16x256xf32>
    %31 = arith.mulf %1, %30 : vector<16x256xf32>
    %c0_8 = arith.constant 0 : index
    %c0_9 = arith.constant 0 : index
    %c0_10 = arith.constant 0 : index
    %32 = vector.load %arg3[%c0_8, %c0_9, %c0_10] : memref<1x16x256xf32, #tpu.memory_space<vmem>>, vector<1x16x256xf32>
    %33 = vector.shape_cast %32 : vector<1x16x256xf32> to vector<16x256xf32>
    %34 = vector.shape_cast %31 : vector<16x256xf32> to vector<1x16x256xf32>
    tpu.vector_store %arg3[%c0_8, %c0_9, %c0_10], %34 {strides = array<i32>} : memref<1x16x256xf32, #tpu.memory_space<vmem>>, vector<1x16x256xf32>,
    return
  }
  func.func @transform_0(%arg0: i32) -> i32 {
    %c0_i32 = arith.constant 0 : i32
    %c0_i32_0 = arith.constant 0 : i32
    return %c0_i32 : i32
  }
  func.func @transform_1(%arg0: i32) -> (i32, i32, i32) {
    %c0_i32 = arith.constant 0 : i32
    %c0_i32_0 = arith.constant 0 : i32
    %c0_i32_1 = arith.constant 0 : i32
    return %arg0, %c0_i32, %c0_i32_0 : i32, i32, i32
  }
  func.func @transform_2(%arg0: i32) -> (i32, i32, i32) {
    %c0_i32 = arith.constant 0 : i32
    %c0_i32_0 = arith.constant 0 : i32
    %c0_i32_1 = arith.constant 0 : i32
    return %arg0, %c0_i32, %c0_i32_0 : i32, i32, i32
  }
}

</mosaic_0001>

<bundles_post_ra>
// kernel: tpu_custom_call.1
= control target key start
LH: loop header
LB: loop body
LE: loop exit
PB: predicated region body
PF: predicated region fallthrough
CT: control target
= control target key end

     0   :  { %7 = vsyncpa [#allocation5], 0  ;;  %s783_s0 = inlined_call_operand.hbm [shape: f32[3], index: 0, kind: input, shape index: {}]   ;;  %s784_s1 = inlined_call_operand.hbm [shape: f32[2,16,256], index: 1, kind: input, shape index: {}]   ;;  %s785_s2 = inlined_call_operand.hbm [shape: f32[2,16,256], index: 2, kind: output, shape index: {}]  }
   0x1   :  { %8 = vsyncpa [#allocation3], 0 }
   0x2   :  { %10 = vsyncpa [#allocation3 + $0x1], 0 }
   0x3   :  { %11 = vsyncpa [#allocation4], 0 }
   0x4   :  { %13 = vsyncpa [#allocation4 + $0x1], 0  ;;  %s581_s9 = smov 0   ;;  %s583_s10 = smov 0  }
   0x5   :  { %s585_s11 = smov 0   ;;  %s587_s12 = smov 0  }
   0x6 LB: > { %s602_s13 = sadd.s32 4294967295, %s556_s12   ;;  %s349_s14 = sadd.s32 4294967294, %s556_s12   ;;  %s556_s12 = sphi %s587_s12, %s805_s12   ;;  %s552_s11 = sphi %s585_s11, %s804_s11   ;;  %s548_s10 = sphi %s583_s10, %s803_s10   ;;  %s544_s9 = sphi %s581_s9, %s802_s9  }
   0x7   : > { %s606_s15 = sadd.s32 1, %s556_s12   ;;  %s47_s16 = sadd.s32 1, %s552_s11 }
   0x8   : > { %s44_s17 = ssub.s32 %s556_s12, %s606_s15  ;;  %p54_p0 = scmp.ne.s32.totalorder %s552_s11, %s548_s10 }
   0x9   : > { %p45_p1 = scmp.eq.s32.totalorder %s44_s17, 0  ;;  %p55_p2 = scmp.eq.s32.totalorder %s556_s12, 0 }
   0xa   : > { %p60_p3 = scmp.ne.s32.totalorder %s548_s10, %s544_s9  ;;  %p786_p4 = scmp.eq.s32.totalorder %s602_s13, 0 }
   0xb   : > { %s618_s18 = scalar_select %p45_p1, %s552_s11, %s47_s16  }
   0xc   : > { %p620_p5 = por %p55_p2, %p54_p0  ;;  %p626_p6 = por %p786_p4, %p60_p3 }
   0xd   : > { %p84_p7 = scmp.eq.s32.totalorder %s602_s13, 1  ;;  %p90_p8 = scmp.eq.s32.totalorder %s349_s14, 1 }
   0xe   : > { %s790_s20 = scalar_select %p626_p6, 1, 0 }
   0xf   : > { %p350_p9 = scmp.ge.s32.totalorder %s556_s12, 1  ;;  %p97_p10 = scmp.lt.s32.totalorder %s556_s12, 3 }
  0x10   : > { %p633_p11 = por %p84_p7, %p54_p0  ;;  %p637_p12 = por %p90_p8, %p60_p3 }
  0x11   : > { %p641_p13 = pnand %p350_p9, %p97_p10  ;;  %p392_p4 = scmp.lt.s32.totalorder %s556_s12, 2 }
  0x12   : > { %s791_s21 = scalar_select %p633_p11, 1, 0 }
  0x13   : > { %s792_s22 = scalar_select %p637_p12, 1, 0 }
  0x14   : > { %p379_p2 = pneg %p641_p13  ;;  %s119_s24 = sand.u32 1, %s552_s11  }
  0x15   : > { %s369_s25 = sshll.u32 %s556_s12, 9  ;;  %p794_p6 = scmp.eq.s32.totalorder %s602_s13, 0 }
  0x16   : > { %p655_p7 = pnand %p392_p4, %p620_p5  ;;  %s353_s27 = sshll.u32 %s119_s24, 5 }
  0x17   : > { %p380_p0 = pnand %p379_p2, %p794_p6  ;;  %s443_s30 = scalar_lea.hbm %s783_s0, 16 }
  0x18   : > { %p444_p3 = scmp.ne.s32.totalorder %s783_s0, %s443_s30  ;;  %p450_p6 = scmp.lt.u32.totalorder %s443_s30, %s783_s0 }
  0x19   : > { %p445_p8 = pneg %p380_p0 }
  0x1b   : > { %p446_p9 = pnand %p445_p8, %p444_p3 }
  0x1d   : > { %p447_p10 = pneg %p446_p9 }
  0x1f   : > { %p452_p4 = pnand %p450_p6, %p447_p10 }
  0x21   : > { %455 = shalt.err (!%p452_p4)
}
  0x22   : > { %s558_s7 = smov [#allocation2]   ;;  %s674_s19 = scalar_lea.hbm %s784_s1, %s369_s25 }
  0x23   : > { %382 = dma.hbm_to_smem (!%p380_p0), %s783_s0, 16, %s558_s7, [#allocation5]  }
  0x24   : > { %s123_s28 = scalar_lea.vmem [#allocation6], %s353_s27  ;;  %s678_s30 = scalar_lea.sflag [#allocation3], %s119_s24 }
  0x25   : > { %s130_s29 = sshll.u32 %s123_s28, 4  ;;  %s456_s3 = scalar_lea.hbm %s674_s19, 512  ;;  %s676_s29 = int_to_ptr.vmem [resolvable:$true] %s130_s29 }
  0x26   : > { %p457_p5 = scmp.ne.s32.totalorder %s674_s19, %s456_s3  ;;  %p458_p2 = pneg %p655_p7 }
  0x27   : > { %s461_s5 = scalar_lea.hbm %s784_s1, 1024  ;;  %p462_p8 = scmp.lt.u32.totalorder %s674_s19, %s784_s1 }
  0x28   : > { %p459_p0 = pnand %p458_p2, %p457_p5  ;;  %p463_p9 = scmp.lt.u32.totalorder %s461_s5, %s456_s3 }
  0x29   : > { %p465_p6 = scmp.lt.u32.totalorder %s456_s3, %s674_s19 }
  0x2a   : > { %p460_p3 = pneg %p459_p0  ;;  %p464_p10 = por %p463_p9, %p462_p8 }
  0x2c   : > { %p466_p4 = por %p465_p6, %p464_p10 }
  0x2e   : > { %p467_p1 = pnand %p466_p4, %p460_p3 }
  0x30   : > { %470 = shalt.err (!%p467_p1)
}
  0x31   : > { %s471_s24 = scalar_lea.vmem %s676_s29, 512  ;;  %s559_s27 = smov [#allocation6]  }
  0x32   : > { %p472_p5 = scmp.ne.s32.totalorder %s676_s29, %s471_s24  ;;  %s476_s8 = sshll.u32 %s559_s27, 4  ;;  %s477_s8 = int_to_ptr.vmem [resolvable:$false] %s476_s8 }
  0x33   : > { %s478_s14 = scalar_lea.vmem %s477_s8, 1024  ;;  %p479_p11 = scmp.lt.s32.totalorder %s676_s29, %s477_s8 }
  0x34   : > { %p474_p0 = pnand %p472_p5, %p458_p2  ;;  %p480_p8 = scmp.lt.s32.totalorder %s478_s14, %s471_s24 }
  0x36   : > { %p475_p12 = pneg %p474_p0  ;;  %p481_p9 = por %p480_p8, %p479_p11 }
  0x38   : > { %p482_p10 = pnand %p481_p9, %p475_p12 }
  0x3a   : > { %485 = shalt.err (!%p482_p10)
}
  0x3b   : > { %s560_s16 = smov 256   ;;  %s561_s17 = smov 16  }
  0x3c   : > { %386 = dma.hbm_to_vmem [thread:$0]  (!%p655_p7), %s674_s19, 512, %s676_s29, %s678_s30, %s560_s16, %s560_s16, %s561_s17  }
  0x3d   : > { %142 = sbr.rel (%p641_p13) target bundleno = 408 (0x198), region = 28  ;;  %p796_p1 = scmp.eq.s32.totalorder (!%p641_p13), %s602_s13, 0 }
  0x44   : > { %531 = dma.done.wait (%p796_p1), [#allocation5], 16   ;;  %p797_p2 = pmov %p796_p1 }
  0x45   : > { %s713_s28 = sand.u32 1, %s548_s10   ;;  %p798_p11 = scmp.ne.s32.totalorder %s790_s20, 0 }
  0x46   : > { %533 = vsyncadd (%p797_p2), [#allocation5], 4294967280  ;;  %s358_s3 = sshll.u32 %s713_s28, 5  ;;  %s149_s25 = scalar_lea.sflag [#allocation3], %s713_s28 }
  0x47   : > { %s152_s26 = scalar_lea.vmem [#allocation6], %s358_s3 }
  0x48   : > { %535 = dma.done.wait (%p798_p11), %s149_s25, 512  }
  0x49   : > { %537 = vsyncadd (%p798_p11), %s149_s25, 4294966784 }
  0x4a   : > { %157 = sfence }
  0x4b   : > { %v174_v0 = vld [vmem:[%s152_s26] sm:$0xff]  ;;  %v175_v1 = vld [vmem:[%s152_s26 + $0x8] sm:$0xff]  ;;  %v723_v2 = vld [vmem:[%s152_s26 + $0x10] sm:$0xff]  ;;  %v562_v6 = vmov 0   ;;  %s195_s23 = sld [smem:[#allocation2]]  ;;  %s360_s19 = sld [smem:[#allocation2 + $0x1]] }
  0x4c   : > { %v178_v3 = vadd.f32 %v175_v1, %v174_v0  ;;  %v725_v4 = vld [vmem:[%s152_s26 + $0x18] sm:$0xff]  ;;  %433 = vset.pattern.permute.xlu1 %v562_v6  ;;  %434 = vset.pattern.permute.xlu0 %v562_v6  ;;  %s361_s20 = sld [smem:[#allocation2 + $0x2]]  ;;  %vm188_vm0 = vcmask 1040384   ;;  %vm207_vm1 = vcmask 1046528   ;;  %s173_s29 = scalar_lea.vmem [#allocation7], %s358_s3 }
  0x4d   : > { %v181_v5 = vadd.f32 %v725_v4, %v723_v2  ;;  %s264_s30 = sshll.u32 %s173_s29, 4  ;;  %s370_s4 = sshll.u32 %s602_s13, 9  ;;  %s732_s30 = int_to_ptr.vmem [resolvable:$true] %s264_s30 }
  0x4e   : > { %179 = vadd.xlane.f32.xlu0 %v178_v3  ;;  %s737_s7 = scalar_lea.hbm %s785_s2, %s370_s4  ;;  %s251_s13 = scalar_lea.sflag [#allocation4], %s713_s28 }
  0x4f   : > { %s486_s24 = scalar_lea.vmem %s732_s30, 512  ;;  %p799_p13 = scmp.ne.s32.totalorder %s791_s21, 0 }
  0x50   : > { %p487_p12 = scmp.ne.s32.totalorder %s732_s30, %s486_s24  ;;  %s563_s27 = smov [#allocation7]  }
  0x51   : > { %v196_v9 = vstv %s195_s23  ;;  %v202_v12 = vstv %s360_s19  ;;  %s490_s8 = sshll.u32 %s563_s27, 4  ;;  %s491_s8 = int_to_ptr.vmem [resolvable:$false] %s490_s8 }
  0x52   : > { %182 = vadd.xlane.f32.xlu0 %v181_v5  ;;  %v215_v17 = vstv %s361_s20  ;;  %p488_p7 = pnand %p487_p12, %p799_p13  ;;  %s492_s14 = scalar_lea.vmem %s491_s8, 1024 }
  0x53   : > { %p493_p6 = scmp.lt.s32.totalorder %s732_s30, %s491_s8  ;;  %p494_p4 = scmp.lt.s32.totalorder %s492_s14, %s486_s24 }
  0x54   : > { %p489_p3 = pneg %p488_p7 }
  0x55   : > { %p495_p5 = por %p494_p4, %p493_p6 }
  0x57   : > { %p496_p0 = pnand %p495_p5, %p489_p3 }
  0xdb   : > { %v180_v7 = vpop.xlane.xlu0 %179 }
  0xdc   : > { %v184_v8 = vmul.f32 0.00390625, %v180_v7 }
  0xde   : > { %v189_v10 = vrot.slane %v184_v8, 7  ;;  %v208_v16 = vrot.slane %v184_v8, 1  ;;  %v203_v20 = vmul.f32 %v202_v12, %v184_v8 }
  0xdf   : > { %v183_v11 = vpop.xlane.xlu0 %182 }
  0xe0   : > { %v194_v13 = vsel %vm188_vm0, 0.0, %v189_v10  ;;  %v185_v14 = vmul.f32 0.00390625, %v183_v11 }
  0xe1   : > { %v197_v15 = vmul.f32 %v196_v9, %v194_v13 }
  0xe2   : > { %v190_v18 = vrot.slane %v185_v14, 7  ;;  %v209_v19 = vrot.slane %v185_v14, 1  ;;  %v204_v26 = vmul.f32 %v202_v12, %v185_v14 }
  0xe3   : > { %v205_v24 = vadd.f32 %v203_v20, %v197_v15 }
  0xe4   : > { %v191_v21 = vsel %vm188_vm0, %v189_v10, %v190_v18  ;;  %v210_v22 = vsel %vm207_vm1, %v208_v16, %v209_v19  ;;  %v213_v23 = vsel %vm207_vm1, %v209_v19, 0.0 }
  0xe5   : > { %v198_v25 = vmul.f32 %v196_v9, %v191_v21  ;;  %v216_v27 = vmul.f32 %v215_v17, %v210_v22  ;;  %v217_v29 = vmul.f32 %v215_v17, %v213_v23 }
  0xe7   : > { %v206_v28 = vadd.f32 %v204_v26, %v198_v25  ;;  %v218_v30 = vadd.f32 %v216_v27, %v205_v24 }
  0xe9   : > { %v219_v31 = vadd.f32 %v217_v29, %v206_v28  ;;  %v362_v32 = vmul.f32 -1.442695, %v218_v30 }
  0xeb   : > { %435 = vpow2.f32 %v362_v32  ;;  %v363_v33 = vmul.f32 -1.442695, %v219_v31 }
  0xed   : > { %437 = vpow2.f32 %v363_v33 }
  0xf5   : > { %v436_v34 = vpop.eup %435 }
  0xf6   : > { %v226_v35 = vadd.f32 1.0, %v436_v34 }
  0xf7   : > { %v438_v36 = vpop.eup %437 }
  0xf8   : > { %v227_v37 = vadd.f32 1.0, %v438_v36  ;;  %439 = vrcp.f32 %v226_v35 }
  0xfa   : > { %441 = vrcp.f32 %v227_v37 }
 0x102   : > { %v440_v38 = vpop.eup %439 }
 0x103   : > { %234 = vperm.xlu1 %433, %v440_v38  }
 0x104   : > { %v442_v39 = vpop.eup %441 }
 0x107   : > { %239 = vperm.xlu1 %433, %v442_v39  }
 0x182   : > { %v235_v40 = vpop.permute.xlu1 %234 }
 0x183   : > { %v242_v41 = vmul.f32 %v235_v40, %v174_v0  ;;  %v243_v42 = vmul.f32 %v235_v40, %v175_v1 }
 0x185   : > { %246 = vst [vmem:[%s173_s29] sm:$0xff] %v242_v41  ;;  %247 = vst [vmem:[%s173_s29 + $0x8] sm:$0xff] %v243_v42 }
 0x186   : > { %v240_v43 = vpop.permute.xlu1 %239 }
 0x187   : > { %v244_v44 = vmul.f32 %v240_v43, %v723_v2  ;;  %v245_v45 = vmul.f32 %v240_v43, %v725_v4 }
 0x189   : > { %248 = vst [vmem:[%s173_s29 + $0x10] sm:$0xff] %v244_v44  ;;  %249 = vst [vmem:[%s173_s29 + $0x18] sm:$0xff] %v245_v45 }
 0x18a   : > { %499 = shalt.err (!%p496_p0)
}
 0x18b   : > { %s500_s16 = scalar_lea.hbm %s737_s7, 512  ;;  %s504_s25 = scalar_lea.hbm %s785_s2, 1024 }
 0x18c   : > { %p501_p8 = scmp.ne.s32.totalorder %s737_s7, %s500_s16  ;;  %p505_p1 = scmp.lt.u32.totalorder %s737_s7, %s785_s2 }
 0x18d   : > { %p506_p2 = scmp.lt.u32.totalorder %s504_s25, %s500_s16  ;;  %p508_p12 = scmp.lt.u32.totalorder %s500_s16, %s737_s7 }
 0x18e   : > { %p502_p9 = pnand %p501_p8, %p799_p13 }
 0x18f   : > { %p507_p11 = por %p506_p2, %p505_p1 }
 0x190   : > { %p503_p10 = pneg %p502_p9 }
 0x191   : > { %p509_p7 = por %p508_p12, %p507_p11 }
 0x193   : > { %p510_p3 = pnand %p509_p7, %p503_p10 }
 0x195   : > { %513 = shalt.err (!%p510_p3)
}
 0x196   : > { %s564_s19 = smov 256   ;;  %s565_s20 = smov 16  }
 0x197   : > { %377 = dma.vmem_to_hbm [thread:$0]  (%p799_p13), %s732_s30, 512, %s737_s7, %s251_s13, %s564_s19, %s564_s19, %s565_s20  }
 0x198 PF: > { %s279_s29 = sand.u32 1, %s544_s9   ;;  %p800_p6 = scmp.ne.s32.totalorder %s792_s22, 0 }
 0x199   : > { %p801_p4 = scmp.ge.s32.totalorder %s556_s12, 2  ;;  %s280_s4 = scalar_lea.sflag [#allocation4], %s279_s29 }
 0x19b   : > { %p388_p5 = pnand %p801_p4, %p800_p6 }
 0x19d   : > { %539 = dma.done.wait (!%p388_p5), %s280_s4, 512  }
 0x19e   : > { %541 = vsyncadd (!%p388_p5), %s280_s4, 4294966784  ;;  %p16_p0 = scmp.ge.s32.totalorder %s606_s15, 4   ;;  %s802_s9 = smov %s548_s10 }
 0x19f   : > { %s803_s10 = smov %s552_s11  ;;  %s804_s11 = smov %s618_s18 }
 0x1a0   : > { %s805_s12 = smov %s606_s15  ;;  %18 = sbr.rel (!%p16_p0) target bundleno = 6 (0x6), region = 78 }
 0x1a7   :  { %285 = vsyncpa [#allocation3], 1 }
 0x1a8   :  { %287 = vsyncpa [#allocation3 + $0x1], 1 }
 0x1a9   :  { %288 = vsyncpa [#allocation4], 1 }
 0x1aa   :  { %290 = vsyncpa [#allocation4 + $0x1], 1 }
 0x1ab   :  { %291 = vsyncpa [#allocation5], 1 }
 0x1ac   :  { %293 = vsyncpa [#allocation5 + $0x1], 1 }

</bundles_post_ra>
